<compile_context>
chip_gen: v7x
topology: tpu7x:2x2x1
jax: 0.10.0
libtpu: 0.0.40
codegen_flags: <defaults>
</compile_context>

<pallas_src>
import functools
import math

import jax
import jax.numpy as jnp
import numpy as np
from jax import lax
from jax.experimental import pallas as pl
from jax.experimental.pallas import tpu as pltpu


def _round_up(x, m):
    return ((x + m - 1) // m) * m


def _relation_unit_kernel(fa_ref, pos_ref, wkqv_ref, bkqv_ref, wgbd_ref, wgb_ref,
                          out_ref, *, n, bb, kp):
    """One batch block (bb items, bb*n rows) per grid step."""
    # Fused K/Q/V projection for the whole batch block: one bf16 MXU pass,
    # f32 accumulation.  Weight layout: [K | Q | V], each padded to kp lanes;
    # the 1/sqrt(dim_k) scale is folded into the K block and K bias.
    kqv = jnp.dot(fa_ref[...], wkqv_ref[...],
                  preferred_element_type=jnp.float32) + bkqv_ref[...]    # (bb*n, 3*kp)

    # Geometry gate for the whole batch block: the block-diagonal weight is
    # shared across items, so (bb*n, n*G) @ (n*G, n) gives all bb gates at
    # once, each landing directly in 2-D layout.  relu + clamp + log fused:
    # log(max(relu(x), 1e-6)) == log(max(x, 1e-6)).  Scalar bias from SMEM.
    w_g = jnp.dot(pos_ref[...], wgbd_ref[...],
                  preferred_element_type=jnp.float32) + wgb_ref[0, 0]    # (bb*n, n)
    gate_log = jnp.log(jnp.maximum(w_g, 1e-6))

    # Per-item attention (tiny N x N work); bb is small and static -> unrolled.
    for t in range(bb):
        r0 = t * n
        w_k = kqv[r0:r0 + n, 0 * kp:1 * kp]                              # (n, kp)
        w_q = kqv[r0:r0 + n, 1 * kp:2 * kp]                              # (n, kp)
        w_v = kqv[r0:r0 + n, 2 * kp:3 * kp]                              # (n, kp) zero-padded

        # scaled_dot[i, j] = <w_k[i], w_q[j]> / sqrt(dim_k) (scale pre-folded).
        # Contract on last dims -> no materialized transpose; padded lanes are 0.
        scaled_dot = lax.dot_general(
            w_k.astype(jnp.bfloat16), w_q.astype(jnp.bfloat16),
            dimension_numbers=(((1,), (1,)), ((), ())),
            preferred_element_type=jnp.float32)                          # (n, n)

        logits = gate_log[r0:r0 + n, :] + scaled_dot

        # Row softmax (dim=1), numerically stable; divide on the EUP.
        m = jnp.max(logits, axis=1, keepdims=True)
        p = jnp.exp(logits - m)
        denom = jnp.sum(p, axis=1, keepdims=True)
        attn = p * pl.reciprocal(denom, approx=True)                     # (n, n)

        out = jnp.dot(attn.astype(jnp.bfloat16), w_v.astype(jnp.bfloat16),
                      preferred_element_type=jnp.float32)                # (n, kp)
        out_ref[r0:r0 + n, :] = out.astype(out_ref.dtype)                # full-lane store

    # TODO(synk): distance_weight branch (torch.where + extra log term) omitted;
    # the kernel is only valid for distance_weight=None.


def _pack_params(params, n_rois):
    """Pre-pack torch-style (out, in) weights into the kernel layout."""
    wk_w, wq_w, wv_w = params["wk_w"], params["wq_w"], params["wv_w"]
    key_dim, app_dim = wk_w.shape
    geo_dim = params["wg_w"].shape[1]
    kp = _round_up(key_dim, 128)
    scale = jnp.float32(1.0 / math.sqrt(key_dim))

    w_kqv = jnp.zeros((app_dim, 3 * kp), jnp.float32)
    w_kqv = w_kqv.at[:, 0 * kp:0 * kp + key_dim].set(wk_w.T * scale)
    w_kqv = w_kqv.at[:, 1 * kp:1 * kp + key_dim].set(wq_w.T)
    w_kqv = w_kqv.at[:, 2 * kp:2 * kp + key_dim].set(wv_w.T)

    b_kqv = jnp.zeros((1, 3 * kp), jnp.float32)
    b_kqv = b_kqv.at[0, 0 * kp:0 * kp + key_dim].set(params["wk_b"] * scale)
    b_kqv = b_kqv.at[0, 1 * kp:1 * kp + key_dim].set(params["wq_b"])
    b_kqv = b_kqv.at[0, 2 * kp:2 * kp + key_dim].set(params["wv_b"])

    # Block-diagonal geometry weight: W[j*G + g, j] = wg[g]  -> (N*G, N).
    # Fine at small N; replace with a VPU multiply + lane reduce for large N.
    wg = params["wg_w"].reshape(geo_dim).astype(jnp.float32)
    wg_bd = jnp.kron(jnp.eye(n_rois, dtype=jnp.float32), wg[:, None])

    wg_b = params["wg_b"].reshape(1, 1).astype(jnp.float32)
    return (w_kqv.astype(jnp.bfloat16), b_kqv, wg_bd.astype(jnp.bfloat16),
            wg_b, key_dim, kp)


def relation_unit_batched(f_a, position_embedding, params):
    """f_a: (B, N, D_app) f32, position_embedding: (B, N, N, D_geo) f32."""
    B, N, app_dim = f_a.shape
    geo_dim = params["wg_w"].shape[1]
    w_kqv, b_kqv, wg_bd, wg_b, key_dim, kp = _pack_params(params, N)

    # 2 "parallel" grid steps -> both v7x TensorCores; bb items per step so the
    # fused projections see bb*N rows in one MXU pass.
    num_blocks = 2 if (B % 2 == 0 and B >= 2) else 1
    bb = B // num_blocks

    # Flatten to 2-D wrapper-side (no in-kernel reshapes) and cast the big
    # streamed operands to bf16 (halves HBM->VMEM DMA; single-pass MXU matmuls).
    fa2d = f_a.reshape(B * N, app_dim).astype(jnp.bfloat16)
    pos2d = position_embedding.reshape(B * N, N * geo_dim).astype(jnp.bfloat16)

    kernel = functools.partial(_relation_unit_kernel, n=N, bb=bb, kp=kp)
    grid_spec = pltpu.PrefetchScalarGridSpec(
        num_scalar_prefetch=0,
        grid=(num_blocks,),
        in_specs=[
            pl.BlockSpec((bb * N, app_dim), lambda b: (b, 0)),          # f_a (bf16)
            pl.BlockSpec((bb * N, N * geo_dim), lambda b: (b, 0)),      # pos (bf16)
            pl.BlockSpec((app_dim, 3 * kp), lambda b: (0, 0)),          # fused KQV W (resident)
            pl.BlockSpec((1, 3 * kp), lambda b: (0, 0)),                # fused KQV b (resident)
            pl.BlockSpec((N * geo_dim, N), lambda b: (0, 0)),           # geo block-diag W (resident)
            pl.BlockSpec(memory_space=pltpu.MemorySpace.SMEM),          # geo scalar bias
        ],
        out_specs=pl.BlockSpec((bb * N, kp), lambda b: (b, 0)),         # lane-dense padded out
    )
    out_padded = pl.pallas_call(
        kernel,
        out_shape=jax.ShapeDtypeStruct((B * N, kp), jnp.float32),
        grid_spec=grid_spec,
        compiler_params=pltpu.CompilerParams(
            dimension_semantics=("parallel",),
            vmem_limit_bytes=32 * 1024 * 1024),
    )(fa2d, pos2d, w_kqv, b_kqv, wg_bd, wg_b)

    # Strip the lane padding back to key_dim.
    return out_padded[:, :key_dim].reshape(B, N, key_dim)


def relation_unit(f_a, position_embedding, params):
    """Single-instance convenience wrapper matching the torch forward signature."""
    out = relation_unit_batched(f_a[None], position_embedding[None], params)
    return out[0]


def reference_single(f_a, position_embedding, params):
    """Plain-JAX re-implementation of the torch forward (f32) for verification."""
    N = f_a.shape[0]
    dim_g = params["wg_w"].shape[1]
    dim_k = params["wk_w"].shape[0]
    pos = position_embedding.reshape(-1, dim_g)
    w_g = jnp.maximum(pos @ params["wg_w"].T + params["wg_b"], 0.0).reshape(N, N)
    w_k = f_a @ params["wk_w"].T + params["wk_b"]
    w_q = f_a @ params["wq_w"].T + params["wq_b"]
    scaled_dot = (w_k @ w_q.T) / np.sqrt(dim_k)
    w_mn = jnp.log(jnp.maximum(w_g, 1e-6)) + scaled_dot
    attn = jax.nn.softmax(w_mn, axis=1)
    w_v = f_a @ params["wv_w"].T + params["wv_b"]
    return attn @ w_v


def init_params(key, appearance_dim, key_dim, geo_dim):
    ks = jax.random.split(key, 8)
    s = 0.05
    return {
        "wg_w": s * jax.random.normal(ks[0], (1, geo_dim), jnp.float32),
        "wg_b": s * jax.random.normal(ks[1], (1,), jnp.float32),
        "wk_w": s * jax.random.normal(ks[2], (key_dim, appearance_dim), jnp.float32),
        "wk_b": s * jax.random.normal(ks[3], (key_dim,), jnp.float32),
        "wq_w": s * jax.random.normal(ks[4], (key_dim, appearance_dim), jnp.float32),
        "wq_b": s * jax.random.normal(ks[5], (key_dim,), jnp.float32),
        "wv_w": s * jax.random.normal(ks[6], (key_dim, appearance_dim), jnp.float32),
        "wv_b": s * jax.random.normal(ks[7], (key_dim,), jnp.float32),
    }


if __name__ == "__main__":
    B, N, APP_DIM, KEY_DIM, GEO_DIM = 4, 16, 128, 64, 64

    root = jax.random.PRNGKey(0)
    k_fa, k_pos, k_param = jax.random.split(root, 3)

    f_a = jax.random.normal(k_fa, (B, N, APP_DIM), jnp.float32)
    position_embedding = jax.random.normal(k_pos, (B, N, N, GEO_DIM), jnp.float32)
    params = init_params(k_param, APP_DIM, KEY_DIM, GEO_DIM)

    out = jax.block_until_ready(relation_unit_batched(f_a, position_embedding, params))

    ref = jax.vmap(lambda x, p: reference_single(x, p, params))(f_a, position_embedding)
    ref = jax.block_until_ready(ref)

    # bf16 matmul inputs (incl. the gate matmul feeding jnp.log) + approx
    # reciprocal -> looser tolerance than pure f32.
    np.testing.assert_allclose(np.asarray(out), np.asarray(ref),
                               rtol=3e-2, atol=3e-2)

    print("KERNEL_OK")
</pallas_src>

<mosaic_0001>
module attributes {stable_mosaic.version = 11 : i64} {
  func.func @_relation_unit_kernel(%arg0: i32, %arg1: memref<32x128xbf16, #tpu.memory_space<vmem>>, %arg2: memref<32x1024xbf16, #tpu.memory_space<vmem>>, %arg3: memref<128x384xbf16, #tpu.memory_space<vmem>>, %arg4: memref<1x384xf32, #tpu.memory_space<vmem>>, %arg5: memref<1024x16xbf16, #tpu.memory_space<vmem>>, %arg6: memref<1x1xf32, #tpu.memory_space<smem>>, %arg7: memref<32x128xf32, #tpu.memory_space<vmem>>) attributes {dimension_semantics = [#tpu.dimension_semantics<parallel>], iteration_bounds = array<i64: 2>, scalar_prefetch = 0 : i64, scratch_operands = 0 : i64, tpu.core_type = #tpu.core_type<tc>, window_params = [{transform_indices = @transform_0, window_bounds = array<i64: 32, 128>}, {transform_indices = @transform_1, window_bounds = array<i64: 32, 1024>}, {pipeline_mode = #tpu.pipeline_mode<synchronous>, transform_indices = @transform_2, window_bounds = array<i64: 128, 384>}, {pipeline_mode = #tpu.pipeline_mode<synchronous>, transform_indices = @transform_3, window_bounds = array<i64: 1, 384>}, {pipeline_mode = #tpu.pipeline_mode<synchronous>, transform_indices = @transform_4, window_bounds = array<i64: 1024, 16>}, {transform_indices = @transform_5, window_bounds = array<i64: 1, 1>}, {transform_indices = @transform_6, window_bounds = array<i64: 32, 128>}]} {
    %c0 = arith.constant 0 : index
    %c0_0 = arith.constant 0 : index
    %0 = vector.load %arg1[%c0, %c0_0] : memref<32x128xbf16, #tpu.memory_space<vmem>>, vector<32x128xbf16>
    %c0_1 = arith.constant 0 : index
    %c0_2 = arith.constant 0 : index
    %1 = vector.load %arg3[%c0_1, %c0_2] : memref<128x384xbf16, #tpu.memory_space<vmem>>, vector<128x384xbf16>
    %cst = arith.constant dense<0.000000e+00> : vector<32x384xf32>
    %2 = tpu.matmul %0, %1, %cst {dimension_numbers = #tpu.dot_dimension_numbers<[1], [0], [0], [1], [0, 0, 1, 1], [], []>} : vector<32x128xbf16>, vector<128x384xbf16>, vector<32x384xf32> -> vector<32x384xf32>
    %c0_3 = arith.constant 0 : index
    %c0_4 = arith.constant 0 : index
    %3 = vector.load %arg4[%c0_3, %c0_4] : memref<1x384xf32, #tpu.memory_space<vmem>>, vector<1x384xf32>
    %4 = vector.broadcast %3 : vector<1x384xf32> to vector<32x384xf32>
    %5 = arith.addf %2, %4 : vector<32x384xf32>
    %c0_5 = arith.constant 0 : index
    %c0_6 = arith.constant 0 : index
    %6 = vector.load %arg2[%c0_5, %c0_6] : memref<32x1024xbf16, #tpu.memory_space<vmem>>, vector<32x1024xbf16>
    %c0_7 = arith.constant 0 : index
    %c0_8 = arith.constant 0 : index
    %7 = vector.load %arg5[%c0_7, %c0_8] : memref<1024x16xbf16, #tpu.memory_space<vmem>>, vector<1024x16xbf16>
    %cst_9 = arith.constant dense<0.000000e+00> : vector<32x16xf32>
    %8 = tpu.matmul %6, %7, %cst_9 {dimension_numbers = #tpu.dot_dimension_numbers<[1], [0], [0], [1], [0, 0, 1, 1], [], []>} : vector<32x1024xbf16>, vector<1024x16xbf16>, vector<32x16xf32> -> vector<32x16xf32>
    %c0_10 = arith.constant 0 : index
    %c0_11 = arith.constant 0 : index
    %9 = memref.load %arg6[%c0_10, %c0_11] : memref<1x1xf32, #tpu.memory_space<smem>>
    %10 = vector.broadcast %9 : f32 to vector<32x16xf32>
    %11 = arith.addf %8, %10 : vector<32x16xf32>
    %cst_12 = arith.constant 9.99999997E-7 : f32
    %12 = vector.broadcast %cst_12 : f32 to vector<32x16xf32>
    %13 = arith.maximumf %11, %12 : vector<32x16xf32>
    %14 = math.log %13 : vector<32x16xf32>
    %15 = vector.extract_strided_slice %5 {offsets = [0, 0], sizes = [16, 128], strides = [1, 1]} : vector<32x384xf32> to vector<16x128xf32>
    %16 = vector.extract_strided_slice %5 {offsets = [0, 128], sizes = [16, 128], strides = [1, 1]} : vector<32x384xf32> to vector<16x128xf32>
    %17 = vector.extract_strided_slice %5 {offsets = [0, 256], sizes = [16, 128], strides = [1, 1]} : vector<32x384xf32> to vector<16x128xf32>
    %18 = arith.truncf %15 : vector<16x128xf32> to vector<16x128xbf16>
    %19 = arith.truncf %16 : vector<16x128xf32> to vector<16x128xbf16>
    %cst_13 = arith.constant dense<0.000000e+00> : vector<16x16xf32>
    %20 = tpu.matmul %18, %19, %cst_13 {dimension_numbers = #tpu.dot_dimension_numbers<[1], [1], [0], [0], [0, 0, 1, 0], [], []>} : vector<16x128xbf16>, vector<16x128xbf16>, vector<16x16xf32> -> vector<16x16xf32>
    %21 = vector.extract_strided_slice %14 {offsets = [0, 0], sizes = [16, 16], strides = [1, 1]} : vector<32x16xf32> to vector<16x16xf32>
    %22 = arith.addf %21, %20 : vector<16x16xf32>
    %cst_14 = arith.constant dense<0xFF800000> : vector<16xf32>
    %23 = vector.multi_reduction <maximumf>, %22, %cst_14 [1] : vector<16x16xf32> to vector<16xf32>
    %24 = vector.shape_cast %23 : vector<16xf32> to vector<16x1xf32>
    %25 = vector.broadcast %24 : vector<16x1xf32> to vector<16x16xf32>
    %26 = arith.subf %22, %25 : vector<16x16xf32>
    %27 = math.exp %26 : vector<16x16xf32>
    %cst_15 = arith.constant dense<0.000000e+00> : vector<16xf32>
    %28 = vector.multi_reduction <add>, %27, %cst_15 [1] : vector<16x16xf32> to vector<16xf32>
    %29 = vector.shape_cast %28 : vector<16xf32> to vector<16x1xf32>
    %30 = tpu.reciprocal %29 {approx = true} : vector<16x1xf32> -> vector<16x1xf32>
    %31 = vector.broadcast %30 : vector<16x1xf32> to vector<16x16xf32>
    %32 = arith.mulf %27, %31 : vector<16x16xf32>
    %33 = arith.truncf %32 : vector<16x16xf32> to vector<16x16xbf16>
    %34 = arith.truncf %17 : vector<16x128xf32> to vector<16x128xbf16>
    %cst_16 = arith.constant dense<0.000000e+00> : vector<16x128xf32>
    %35 = tpu.matmul %33, %34, %cst_16 {dimension_numbers = #tpu.dot_dimension_numbers<[1], [0], [0], [1], [0, 0, 1, 1], [], []>} : vector<16x16xbf16>, vector<16x128xbf16>, vector<16x128xf32> -> vector<16x128xf32>
    %c0_17 = arith.constant 0 : index
    %c0_18 = arith.constant 0 : index
    %36 = vector.load %arg7[%c0_17, %c0_18] : memref<32x128xf32, #tpu.memory_space<vmem>>, vector<16x128xf32>
    tpu.vector_store %arg7[%c0_17, %c0_18], %35 {strides = array<i32>} : memref<32x128xf32, #tpu.memory_space<vmem>>, vector<16x128xf32>,
    %37 = vector.extract_strided_slice %5 {offsets = [16, 0], sizes = [16, 128], strides = [1, 1]} : vector<32x384xf32> to vector<16x128xf32>
    %38 = vector.extract_strided_slice %5 {offsets = [16, 128], sizes = [16, 128], strides = [1, 1]} : vector<32x384xf32> to vector<16x128xf32>
    %39 = vector.extract_strided_slice %5 {offsets = [16, 256], sizes = [16, 128], strides = [1, 1]} : vector<32x384xf32> to vector<16x128xf32>
    %40 = arith.truncf %37 : vector<16x128xf32> to vector<16x128xbf16>
    %41 = arith.truncf %38 : vector<16x128xf32> to vector<16x128xbf16>
    %cst_19 = arith.constant dense<0.000000e+00> : vector<16x16xf32>
    %42 = tpu.matmul %40, %41, %cst_19 {dimension_numbers = #tpu.dot_dimension_numbers<[1], [1], [0], [0], [0, 0, 1, 0], [], []>} : vector<16x128xbf16>, vector<16x128xbf16>, vector<16x16xf32> -> vector<16x16xf32>
    %43 = vector.extract_strided_slice %14 {offsets = [16, 0], sizes = [16, 16], strides = [1, 1]} : vector<32x16xf32> to vector<16x16xf32>
    %44 = arith.addf %43, %42 : vector<16x16xf32>
    %cst_20 = arith.constant dense<0xFF800000> : vector<16xf32>
    %45 = vector.multi_reduction <maximumf>, %44, %cst_20 [1] : vector<16x16xf32> to vector<16xf32>
    %46 = vector.shape_cast %45 : vector<16xf32> to vector<16x1xf32>
    %47 = vector.broadcast %46 : vector<16x1xf32> to vector<16x16xf32>
    %48 = arith.subf %44, %47 : vector<16x16xf32>
    %49 = math.exp %48 : vector<16x16xf32>
    %cst_21 = arith.constant dense<0.000000e+00> : vector<16xf32>
    %50 = vector.multi_reduction <add>, %49, %cst_21 [1] : vector<16x16xf32> to vector<16xf32>
    %51 = vector.shape_cast %50 : vector<16xf32> to vector<16x1xf32>
    %52 = tpu.reciprocal %51 {approx = true} : vector<16x1xf32> -> vector<16x1xf32>
    %53 = vector.broadcast %52 : vector<16x1xf32> to vector<16x16xf32>
    %54 = arith.mulf %49, %53 : vector<16x16xf32>
    %55 = arith.truncf %54 : vector<16x16xf32> to vector<16x16xbf16>
    %56 = arith.truncf %39 : vector<16x128xf32> to vector<16x128xbf16>
    %cst_22 = arith.constant dense<0.000000e+00> : vector<16x128xf32>
    %57 = tpu.matmul %55, %56, %cst_22 {dimension_numbers = #tpu.dot_dimension_numbers<[1], [0], [0], [1], [0, 0, 1, 1], [], []>} : vector<16x16xbf16>, vector<16x128xbf16>, vector<16x128xf32> -> vector<16x128xf32>
    %c16 = arith.constant 16 : index
    %c0_23 = arith.constant 0 : index
    %58 = vector.load %arg7[%c16, %c0_23] : memref<32x128xf32, #tpu.memory_space<vmem>>, vector<16x128xf32>
    tpu.vector_store %arg7[%c16, %c0_23], %57 {strides = array<i32>} : memref<32x128xf32, #tpu.memory_space<vmem>>, vector<16x128xf32>,
    return
  }
  func.func @transform_0(%arg0: i32) -> (i32, i32) {
    %c0_i32 = arith.constant 0 : i32
    %c0_i32_0 = arith.constant 0 : i32
    return %arg0, %c0_i32 : i32, i32
  }
  func.func @transform_1(%arg0: i32) -> (i32, i32) {
    %c0_i32 = arith.constant 0 : i32
    %c0_i32_0 = arith.constant 0 : i32
    return %arg0, %c0_i32 : i32, i32
  }
  func.func @transform_2(%arg0: i32) -> (i32, i32) {
    %c0_i32 = arith.constant 0 : i32
    %c0_i32_0 = arith.constant 0 : i32
    %c0_i32_1 = arith.constant 0 : i32
    return %c0_i32, %c0_i32_0 : i32, i32
  }
  func.func @transform_3(%arg0: i32) -> (i32, i32) {
    %c0_i32 = arith.constant 0 : i32
    %c0_i32_0 = arith.constant 0 : i32
    %c0_i32_1 = arith.constant 0 : i32
    return %c0_i32, %c0_i32_0 : i32, i32
  }
  func.func @transform_4(%arg0: i32) -> (i32, i32) {
    %c0_i32 = arith.constant 0 : i32
    %c0_i32_0 = arith.constant 0 : i32
    %c0_i32_1 = arith.constant 0 : i32
    return %c0_i32, %c0_i32_0 : i32, i32
  }
  func.func @transform_5(%arg0: i32) -> (i32, i32) {
    %c0_i32 = arith.constant 0 : i32
    %c0_i32_0 = arith.constant 0 : i32
    %c0_i32_1 = arith.constant 0 : i32
    return %c0_i32, %c0_i32_0 : i32, i32
  }
  func.func @transform_6(%arg0: i32) -> (i32, i32) {
    %c0_i32 = arith.constant 0 : i32
    %c0_i32_0 = arith.constant 0 : i32
    return %arg0, %c0_i32 : i32, i32
  }
}

</mosaic_0001>

<bundles_post_ra>
// kernel: tpu_custom_call.1
= control target key start
LH: loop header
LB: loop body
LE: loop exit
PB: predicated region body
PF: predicated region fallthrough
CT: control target
= control target key end

     0   :  { %s2714_s0 = inlined_call_operand.vmem [shape: bf16[64,128], index: 0, kind: input, shape index: {}]   ;;  %s2715_s1 = inlined_call_operand.vmem [shape: bf16[64,1024], index: 1, kind: input, shape index: {}]   ;;  %s2716_s2 = inlined_call_operand.vmem [shape: bf16[128,384], index: 2, kind: input, shape index: {}]   ;;  %s2717_s3 = inlined_call_operand.vmem [shape: f32[1,384], index: 3, kind: input, shape index: {}]   ;;  %s2718_s4 = inlined_call_operand.vmem [shape: bf16[1024,16], index: 4, kind: input, shape index: {}]   ;;  %s2719_s5 = inlined_call_operand.<no memory space> [shape: f32[1,1], index: 5, kind: input, shape index: {}]   ;;  %s2720_s6 = inlined_call_operand.hbm [shape: f32[64,128], index: 6, kind: output, shape index: {}]  }
   0x1   :  { %11 = sst [smem:[#allocation2]] %s2719_s5 }
   0x2   :  { %12 = vsyncpa [#allocation4], 0 }
   0x3   :  { %14 = vsyncpa [#allocation4 + $0x1], 0  ;;  %s2285_s23 = smov 0   ;;  %s2287_s24 = smov 0  }
   0x4   :  { %s2289_s25 = smov 0   ;;  %s2291_s26 = smov 0  }
   0x5 LB: > { %s2306_s5 = sadd.s32 4294967295, %s2239_s26   ;;  %s1712_s27 = sadd.s32 4294967294, %s2239_s26   ;;  %s2239_s26 = sphi %s2291_s26, %s2726_s26   ;;  %s2235_s25 = sphi %s2289_s25, %s2725_s25   ;;  %s2231_s24 = sphi %s2287_s24, %s2724_s24   ;;  %s2227_s23 = sphi %s2285_s23, %s2723_s23  }
   0x6   : > { %s2310_s28 = sadd.s32 1, %s2239_s26   ;;  %s163_s29 = sadd.s32 1, %s2235_s25 }
   0x7   : > { %s160_s30 = ssub.s32 %s2239_s26, %s2310_s28  ;;  %p173_p0 = scmp.ne.s32.totalorder %s2235_s25, %s2231_s24 }
   0x8   : > { %p161_p1 = scmp.eq.s32.totalorder %s160_s30, 0  ;;  %p174_p2 = scmp.eq.s32.totalorder %s2306_s5, 1 }
   0x9   : > { %p179_p3 = scmp.ne.s32.totalorder %s2231_s24, %s2227_s23  ;;  %p180_p4 = scmp.eq.s32.totalorder %s1712_s27, 1 }
   0xa   : > { %s2321_s7 = scalar_select %p161_p1, %s2235_s25, %s163_s29  }
   0xb   : > { %p2323_p5 = por %p174_p2, %p173_p0  ;;  %p2327_p6 = por %p180_p4, %p179_p3 }
   0xc   : > { %p1715_p7 = scmp.ge.s32.totalorder %s2239_s26, 1  ;;  %p229_p8 = scmp.lt.s32.totalorder %s2239_s26, 3 }
   0xe   : > { %p230_p9 = pnand %p1715_p7, %p229_p8 }
   0xf   : > { %v2055_v0 = vld [vmem:[%s2716_s2 + $0x4] ss:$12 sps:$4 sm:$0xff] (!%p230_p9)   ;;  %s1717_s12 = sshll.u32 (!%p230_p9), %s2306_s5, 2  ;;  %v2057_v1 = vld [vmem:[%s2716_s2] ss:$12 sps:$4 sm:$0xff] (!%p230_p9)   ;;  %v2241_v2 = vmov (!%p230_p9), 0  }
  0x10   : > { %233 = sbr.rel (%p230_p9) target bundleno = 1045 (0x415), region = 44  ;;  %505 = vmatprep.mubr.bf16.mxu0 (!%p230_p9), %v2241_v2  ;;  %p266_p10 = scmp.lt.s32.totalorder (!%p230_p9), %s1717_s12, 7  ;;  %473 = vmatprep.subr.bf16.mxu0 (!%p230_p9), %v2055_v0  ;;  %v2058_v3 = vld [vmem:[%s2716_s2 + $0x1c] ss:$12 sps:$4 sm:$0xff] (!%p230_p9)   ;;  %v2060_v4 = vld [vmem:[%s2716_s2 + $0x18] ss:$12 sps:$4 sm:$0xff] (!%p230_p9)  }
  0x11   : > { %474 = vmatpush1.bf16.msra.mxu0 (!%p230_p9), %v2057_v1  ;;  %v2061_v5 = vld [vmem:[%s2716_s2 + $0x34] ss:$12 sps:$4 sm:$0xff] (!%p230_p9)   ;;  %v2063_v6 = vld [vmem:[%s2716_s2 + $0x30] ss:$12 sps:$4 sm:$0xff] (!%p230_p9)   ;;  %v2064_v7 = vld [vmem:[%s2716_s2 + $0x4c] ss:$12 sps:$4 sm:$0xff] (!%p230_p9)  }
  0x12   : > { %475 = vmatprep.subr.bf16.mxu0 (!%p230_p9), %v2058_v3  ;;  %v2066_v8 = vld [vmem:[%s2716_s2 + $0x48] ss:$12 sps:$4 sm:$0xff] (!%p230_p9)   ;;  %v2067_v10 = vld [vmem:[%s2716_s2 + $0x64] ss:$12 sps:$4 sm:$0xff] (!%p230_p9)   ;;  %v2082_v12 = vld [vmem:[%s2716_s2 + $0x20] ss:$12 sps:$4 sm:$0xff] (!%p230_p9)  }
  0x13   : > { %v2081_v11 = vld [vmem:[%s2716_s2 + $0x8] ss:$12 sps:$4 sm:$0xff] (!%p230_p9)   ;;  %v2069_v13 = vld [vmem:[%s2716_s2 + $0x60] ss:$12 sps:$4 sm:$0xff] (!%p230_p9)   ;;  %v2083_v15 = vld [vmem:[%s2716_s2 + $0x38] ss:$12 sps:$4 sm:$0xff] (!%p230_p9)  }
  0x14   : > { %1967 = vmatprep.subr.bf16.mxu1 (!%p230_p9), %v2081_v11  ;;  %v2070_v14 = vld [vmem:[%s2716_s2 + $0x7c] ss:$12 sps:$4 sm:$0xff] (!%p230_p9)   ;;  %v2072_v16 = vld [vmem:[%s2716_s2 + $0x78] ss:$12 sps:$4 sm:$0xff] (!%p230_p9)   ;;  %v2073_v17 = vld [vmem:[%s2716_s2 + $0x94] ss:$12 sps:$4 sm:$0xff] (!%p230_p9)  }
  0x15   : > { %476 = vmatpush1.bf16.msra.mxu0 (!%p230_p9), %v2060_v4  ;;  %1968 = vmatpush3.bf16.msra.mxu1 (!%p230_p9), %v2081_v11  ;;  %v2084_v18 = vld [vmem:[%s2716_s2 + $0x50] ss:$12 sps:$4 sm:$0xff] (!%p230_p9)   ;;  %v2076_v20 = vld [vmem:[%s2716_s2 + $0xac] ss:$12 sps:$4 sm:$0xff] (!%p230_p9)   ;;  %v2085_v21 = vld [vmem:[%s2716_s2 + $0x68] ss:$12 sps:$4 sm:$0xff] (!%p230_p9)  }
  0x16   : > { %477 = vmatprep.subr.bf16.mxu0 (!%p230_p9), %v2061_v5  ;;  %1969 = vmatprep.subr.bf16.mxu1 (!%p230_p9), %v2082_v12  ;;  %v2075_v19 = vld [vmem:[%s2716_s2 + $0x90] ss:$12 sps:$4 sm:$0xff] (!%p230_p9)   ;;  %v2078_v22 = vld [vmem:[%s2716_s2 + $0xa8] ss:$12 sps:$4 sm:$0xff] (!%p230_p9)   ;;  %v2089_v23 = vld [vmem:[%s2718_s4 + $0x40] sm:$0xff] (!%p230_p9)   ;;  %vm2243_vm0 = vmmov (!%p230_p9), 0  }
  0x17   : > { %s2728_s12 = smov (!%p266_p10, %s1717_s12), 7  ;;  %v2086_v24 = vld [vmem:[%s2716_s2 + $0x80] ss:$12 sps:$4 sm:$0xff]   ;;  %v2087_v27 = vld [vmem:[%s2716_s2 + $0x98] ss:$12 sps:$4 sm:$0xff]   ;;  %v2097_v29 = vld [vmem:[%s2718_s4 + $0x50] sm:$0xff]  }
  0x18   : > { %s1718_s21 = sshll.u32 %s2728_s12, 2  ;;  %v2090_v25 = vld [vmem:[%s2718_s4] sm:$0xff]   ;;  %v2093_v26 = vld [vmem:[%s2718_s4 + $0x48] sm:$0xff]   ;;  %v2088_v30 = vld [vmem:[%s2716_s2 + $0xb0] ss:$12 sps:$4 sm:$0xff]   ;;  %s1835_s15 = sshll.u32 %s2728_s12, 5 }
  0x19   : > { %s2361_s13 = scalar_lea.vmem %s2714_s0, %s1718_s21  ;;  %478 = vmatpush1.bf16.msra.mxu0 %v2063_v6  ;;  %1970 = vmatpush3.bf16.msra.mxu1 %v2082_v12  ;;  %v2094_v28 = vld [vmem:[%s2718_s4 + $0x8] sm:$0xff]   ;;  %v2098_v32 = vld [vmem:[%s2718_s4 + $0x10] sm:$0xff]   ;;  %v2101_v33 = vld [vmem:[%s2718_s4 + $0x58] sm:$0xff]   ;;  %s2465_s12 = scalar_lea.vmem %s2715_s1, %s1835_s15  ;;  %vm1438_vm1 = vcmask 130048  }
  0x1a   : > { %v2079_v9 = vld [vmem:[%s2361_s13] sm:$0xff]   ;;  %479 = vmatprep.subr.bf16.mxu0 %v2064_v7  ;;  %1971 = vmatprep.subr.bf16.mxu1 %v2083_v15  ;;  %v2080_v31 = vld [vmem:[%s2361_s13 + $0x8] sm:$0xff]   ;;  %v2102_v36 = vld [vmem:[%s2718_s4 + $0x18] sm:$0xff]   ;;  %s719_s18 = sld [smem:[#allocation2]]  ;;  %s262_s19 = sand.u32 1, %s2231_s24  }
  0x1b   : > { %1983 = vmatprep.mubr.bf16.mxu1 %v2079_v9  ;;  %v2091_v34 = vld [vmem:[%s2718_s4 + $0xc0] sm:$0xff]   ;;  %v2095_v38 = vld [vmem:[%s2718_s4 + $0xc8] sm:$0xff]   ;;  %v2099_v42 = vld [vmem:[%s2718_s4 + $0xd0] sm:$0xff]   ;;  %s1716_s20 = sshll.u32 %s262_s19, 5  ;;  %s1836_s13 = sshll.u32 %s2306_s5, 9 }
  0x1c   : > { %v2092_v35 = vld [vmem:[%s2718_s4 + $0x80] sm:$0xff]   ;;  %v2096_v39 = vld [vmem:[%s2718_s4 + $0x88] sm:$0xff]   ;;  %v2100_v43 = vld [vmem:[%s2718_s4 + $0x90] sm:$0xff]   ;;  %s264_s21 = scalar_lea.vmem [#allocation3], %s1716_s20  ;;  %s2671_s30 = scalar_lea.hbm %s2720_s6, %s1836_s13 }
  0x1d   : > { %480 = vmatpush1.bf16.msra.mxu0 %v2066_v8  ;;  %1972 = vmatpush3.bf16.msra.mxu1 %v2083_v15  ;;  %v2105_v37 = vld [vmem:[%s2718_s4 + $0x60] sm:$0xff]   ;;  %v2109_v41 = vld [vmem:[%s2718_s4 + $0x68] sm:$0xff]   ;;  %v2103_v44 = vld [vmem:[%s2718_s4 + $0xd8] sm:$0xff]   ;;  %s1638_s22 = sshll.u32 %s264_s21, 4  ;;  %s2673_s10 = scalar_lea.sflag [#allocation4], %s262_s19  ;;  %s2666_s22 = int_to_ptr.vmem [resolvable:$true] %s1638_s22 }
  0x1e   : > { %481 = vmatprep.subr.bf16.mxu0 %v2067_v10  ;;  %1973 = vmatprep.subr.bf16.mxu1 %v2084_v18  ;;  %v2106_v40 = vld [vmem:[%s2718_s4 + $0x20] sm:$0xff]   ;;  %v2110_v45 = vld [vmem:[%s2718_s4 + $0x28] sm:$0xff]   ;;  %v2113_v46 = vld [vmem:[%s2718_s4 + $0x70] sm:$0xff]   ;;  %s2177_s11 = scalar_lea.vmem %s2666_s22, 512  ;;  %s2244_s5 = smov [#allocation3]  }
  0x1f   : > { %v575_v47 = vld [vmem:[%s2465_s12] sm:$0xff]  ;;  %v2104_v49 = vld [vmem:[%s2718_s4 + $0x98] sm:$0xff]   ;;  %v2114_v51 = vld [vmem:[%s2718_s4 + $0x30] sm:$0xff]   ;;  %p2178_p11 = scmp.ne.s32.totalorder %s2666_s22, %s2177_s11  ;;  %s2181_s14 = sshll.u32 %s2244_s5, 4  ;;  %s2182_s14 = int_to_ptr.vmem [resolvable:$false] %s2181_s14 }
  0x20   : > { %v579_v48 = vld [vmem:[%s2465_s12 + $0x20] sm:$0xff]  ;;  %v576_v52 = vld [vmem:[%s2465_s12 + $0x8] sm:$0xff]  ;;  %v2117_v54 = vld [vmem:[%s2718_s4 + $0x78] sm:$0xff]   ;;  %s2183_s15 = scalar_lea.vmem %s2182_s14, 1024  ;;  %p2184_p0 = scmp.lt.s32.totalorder %s2666_s22, %s2182_s14 }
  0x21   : > { %482 = vmatpush1.bf16.msra.mxu0 %v2069_v13  ;;  %1974 = vmatpush3.bf16.msra.mxu1 %v2084_v18  ;;  %v1749_v50 = vcombine.high %v575_v47, %v579_v48  ;;  %v580_v53 = vld [vmem:[%s2465_s12 + $0x28] sm:$0xff]  ;;  %v2107_v56 = vld [vmem:[%s2718_s4 + $0xe0] sm:$0xff]   ;;  %v2118_v58 = vld [vmem:[%s2718_s4 + $0x38] sm:$0xff]   ;;  %v1748_v62 = vcombine.low %v575_v47, %v579_v48  ;;  %p2179_p12 = pnand %p2178_p11, %p2323_p5  ;;  %p2185_p1 = scmp.lt.s32.totalorder %s2183_s15, %s2177_s11 }
  0x22   : > { %483 = vmatprep.subr.bf16.mxu0 %v2070_v14  ;;  %1975 = vmatprep.subr.bf16.mxu1 %v2085_v21  ;;  %v1751_v55 = vcombine.high %v576_v52, %v580_v53  ;;  %v2108_v57 = vld [vmem:[%s2718_s4 + $0xa0] sm:$0xff]   ;;  %v2111_v60 = vld [vmem:[%s2718_s4 + $0xe8] sm:$0xff]   ;;  %v2115_v1 = vld [vmem:[%s2718_s4 + $0xf0] sm:$0xff]   ;;  %v1750_v11 = vcombine.low %v576_v52, %v580_v53 }
  0x23   : > { %v2121_v59 = vld [vmem:[%s2718_s4 + $0x140] sm:$0xff]   ;;  %v2112_v61 = vld [vmem:[%s2718_s4 + $0xa8] sm:$0xff]   ;;  %v2129_v4 = vld [vmem:[%s2718_s4 + $0x150] sm:$0xff]   ;;  %p2180_p13 = pneg %p2179_p12  ;;  %p2186_p2 = por %p2185_p1, %p2184_p0 }
  0x24   : > { %v2122_v63 = vld [vmem:[%s2718_s4 + $0x100] sm:$0xff]   ;;  %v2125_v0 = vld [vmem:[%s2718_s4 + $0x148] sm:$0xff]   ;;  %v2119_v5 = vld [vmem:[%s2718_s4 + $0xf8] sm:$0xff]  }
  0x25   : > { %484 = vmatpush1.bf16.msra.mxu0 %v2072_v16  ;;  %1976 = vmatpush3.bf16.msra.mxu1 %v2085_v21  ;;  %v2126_v3 = vld [vmem:[%s2718_s4 + $0x108] sm:$0xff]   ;;  %v2120_v6 = vld [vmem:[%s2718_s4 + $0xb8] sm:$0xff]   ;;  %v2130_v7 = vld [vmem:[%s2718_s4 + $0x110] sm:$0xff]   ;;  %p2187_p3 = pnand %p2186_p2, %p2180_p13 }
  0x26   : > { %485 = vmatprep.subr.bf16.mxu0 %v2073_v17  ;;  %1977 = vmatprep.subr.bf16.mxu1 %v2086_v24  ;;  %v2133_v8 = vld [vmem:[%s2718_s4 + $0x158] sm:$0xff]   ;;  %v2124_v10 = vld [vmem:[%s2718_s4 + $0x180] sm:$0xff]   ;;  %v2127_v12 = vld [vmem:[%s2718_s4 + $0x1c8] sm:$0xff]  }
  0x27   : > { %v2134_v13 = vld [vmem:[%s2718_s4 + $0x118] sm:$0xff]   ;;  %v2137_v14 = vld [vmem:[%s2718_s4 + $0x160] sm:$0xff]   ;;  %v2128_v17 = vld [vmem:[%s2718_s4 + $0x188] sm:$0xff]  }
  0x28   : > { %v583_v15 = vld [vmem:[%s2465_s12 + $0x40] sm:$0xff]  ;;  %v2141_v21 = vld [vmem:[%s2718_s4 + $0x168] sm:$0xff]   ;;  %v2152_v53 = vld [vmem:[%s2718_s4 + $0x1b8] sm:$0xff]  }
  0x29   : > { %486 = vmatpush1.bf16.msra.mxu0 %v2075_v19  ;;  %1978 = vmatpush3.bf16.msra.mxu1 %v2086_v24  ;;  %v587_v16 = vld [vmem:[%s2465_s12 + $0x60] sm:$0xff]  ;;  %v2131_v24 = vld [vmem:[%s2718_s4 + $0x1d0] sm:$0xff]   ;;  %v2144_v48 = vld [vmem:[%s2718_s4 + $0x1a8] sm:$0xff]  }
  0x2a   : > { %487 = vmatprep.subr.bf16.mxu0 %v2076_v20  ;;  %1979 = vmatprep.subr.bf16.mxu1 %v2087_v27  ;;  %v2138_v18 = vld [vmem:[%s2718_s4 + $0x120] sm:$0xff]   ;;  %v1757_v19 = vcombine.high %v583_v15, %v587_v16  ;;  %v1756_v20 = vcombine.low %v583_v15, %v587_v16 }
  0x2d   : > { %488 = vmatpush1.bf16.msra.mxu0 %v2078_v22  ;;  %1980 = vmatpush3.bf16.msra.mxu1 %v2087_v27  ;;  %v584_v22 = vld [vmem:[%s2465_s12 + $0x48] sm:$0xff] }
  0x2e   : > { %1847 = vmatprep.subr.bf16.mxu0 %v2089_v23  ;;  %1981 = vmatprep.subr.bf16.mxu1 %v2088_v30  ;;  %v588_v23 = vld [vmem:[%s2465_s12 + $0x68] sm:$0xff] }
  0x2f   : > { %v2142_v27 = vld [vmem:[%s2718_s4 + $0x128] sm:$0xff]  }
  0x30   : > { %506 = vmatmul.mubr.bf16.vlgmr.msra.gmra.mrb[0].mxu0 %v2079_v9  ;;  %v2123_v9 = vld [vmem:[%s2718_s4 + $0x1c0] sm:$0xff]  }
  0x31   : > { %515 = vmatprep.mubr.bf16.mxu0 %v2241_v2  ;;  %1848 = vmatpush3.bf16.msra.mxu0 %v2090_v25  ;;  %v2116_v2 = vld [vmem:[%s2718_s4 + $0xb0] sm:$0xff]   ;;  %v1759_v25 = vcombine.high %v584_v22, %v588_v23 }
  0x32   : > { %1849 = vmatprep.subr.bf16.mxu0 %v2093_v26  ;;  %1982 = vmatpush3.bf16.msra.mxu1 %v2088_v30  ;;  %v2132_v26 = vld [vmem:[%s2718_s4 + $0x190] sm:$0xff]   ;;  %v2135_v30 = vld [vmem:[%s2718_s4 + $0x1d8] sm:$0xff]  }
  0x33   : > { %1875 = vmatprep.subr.bf16.mxu1 %v2091_v34  ;;  %v2146_v34 = vld [vmem:[%s2718_s4 + $0x130] sm:$0xff]  }
  0x35   : > { %1850 = vmatpush3.bf16.msra.mxu0 %v2094_v28  ;;  %1984 = vmatmul.mubr.bf16.vlgmr.msra.gmra.mrb[0].mxu1 %v2080_v31  ;;  %v1758_v28 = vcombine.low %v584_v22, %v588_v23 }
  0x36   : > { %1851 = vmatprep.subr.bf16.mxu0 %v2097_v29  ;;  %1876 = vmatpush3.bf16.msra.mxu1 %v2092_v35  ;;  %v2145_v29 = vld [vmem:[%s2718_s4 + $0x170] sm:$0xff]  }
  0x37   : > { %1877 = vmatprep.subr.bf16.mxu1 %v2095_v38  ;;  %1266 = vmatprep.mubr.bf16.mxu1 %v1751_v55  ;;  %v582_v38 = vld [vmem:[%s2465_s12 + $0x38] sm:$0xff] }
  0x38   : > { %516 = vmatmul.mubr.bf16.gmra.mrb[4].mxu0 %v2080_v31  ;;  %v2136_v31 = vld [vmem:[%s2718_s4 + $0x198] sm:$0xff]  }
  0x39   : > { %1852 = vmatpush3.bf16.msra.mxu0 %v2098_v32  ;;  %1217 = vmatprep.mubr.bf16.mxu0 %v1749_v50  ;;  %v577_v32 = vld [vmem:[%s2465_s12 + $0x10] sm:$0xff]  ;;  %v590_v55 = vld [vmem:[%s2465_s12 + $0x78] sm:$0xff] }
  0x3a   : > { %1853 = vmatprep.subr.bf16.mxu0 %v2101_v33  ;;  %1878 = vmatpush3.bf16.msra.mxu1 %v2096_v39  ;;  %v581_v33 = vld [vmem:[%s2465_s12 + $0x30] sm:$0xff]  ;;  %v2139_v39 = vld [vmem:[%s2718_s4 + $0x1e0] sm:$0xff]  }
  0x3b   : > { %1879 = vmatprep.subr.bf16.mxu1 %v2099_v42  ;;  %v1753_v35 = vcombine.high %v577_v32, %v581_v33  ;;  %v2140_v42 = vld [vmem:[%s2718_s4 + $0x1a0] sm:$0xff]   ;;  %v2148_v50 = vld [vmem:[%s2718_s4 + $0x1b0] sm:$0xff]  }
  0x3d   : > { %1854 = vmatpush3.bf16.msra.mxu0 %v2102_v36  ;;  %v2149_v36 = vld [vmem:[%s2718_s4 + $0x178] sm:$0xff]  }
  0x3e   : > { %1855 = vmatprep.subr.bf16.mxu0 %v2105_v37  ;;  %1880 = vmatpush3.bf16.msra.mxu1 %v2100_v43  ;;  %v578_v37 = vld [vmem:[%s2465_s12 + $0x18] sm:$0xff]  ;;  %v585_v43 = vld [vmem:[%s2465_s12 + $0x50] sm:$0xff] }
  0x3f   : > { %1881 = vmatprep.subr.bf16.mxu1 %v2103_v44  ;;  %v589_v44 = vld [vmem:[%s2465_s12 + $0x70] sm:$0xff] }
  0x40   : > { %v1761_v47 = vcombine.high %v585_v43, %v589_v44  ;;  %v1760_v52 = vcombine.low %v585_v43, %v589_v44 }
  0x41   : > { %1856 = vmatpush3.bf16.msra.mxu0 %v2106_v40  ;;  %v1755_v40 = vcombine.high %v578_v37, %v582_v38 }
  0x42   : > { %1857 = vmatprep.subr.bf16.mxu0 %v2109_v41  ;;  %1882 = vmatpush3.bf16.msra.mxu1 %v2104_v49  ;;  %v2150_v41 = vld [vmem:[%s2718_s4 + $0x138] sm:$0xff]   ;;  %v2147_v49 = vld [vmem:[%s2718_s4 + $0x1f0] sm:$0xff]  }
  0x43   : > { %1883 = vmatprep.subr.bf16.mxu1 %v2107_v56  ;;  %v1754_v56 = vcombine.low %v578_v37, %v582_v38 }
  0x45   : > { %1858 = vmatpush3.bf16.msra.mxu0 %v2110_v45  ;;  %v2143_v45 = vld [vmem:[%s2718_s4 + $0x1e8] sm:$0xff]  }
  0x46   : > { %1859 = vmatprep.subr.bf16.mxu0 %v2113_v46  ;;  %1884 = vmatpush3.bf16.msra.mxu1 %v2108_v57  ;;  %v1752_v46 = vcombine.low %v577_v32, %v581_v33 }
  0x47   : > { %1885 = vmatprep.subr.bf16.mxu1 %v2111_v60  ;;  %v318_v60 = vlaneseq }
  0x49   : > { %1860 = vmatpush3.bf16.msra.mxu0 %v2114_v51  ;;  %v2151_v51 = vld [vmem:[%s2718_s4 + $0x1f8] sm:$0xff]  }
  0x4a   : > { %1861 = vmatprep.subr.bf16.mxu0 %v2117_v54  ;;  %1886 = vmatpush3.bf16.msra.mxu1 %v2112_v61  ;;  %v586_v54 = vld [vmem:[%s2465_s12 + $0x58] sm:$0xff]  ;;  %v319_v61 = vshrl.u32 %v318_v60, 7 }
  0x4b   : > { %1887 = vmatprep.subr.bf16.mxu1 %v2115_v1  ;;  %v1763_v57 = vcombine.high %v586_v54, %v590_v55 }
  0x4d   : > { %1862 = vmatpush3.bf16.msra.mxu0 %v2118_v58  ;;  %v1762_v58 = vcombine.low %v586_v54, %v590_v55 }
  0x4e   : > { %1903 = vmatprep.subr.bf16.mxu0 %v2121_v59  ;;  %1888 = vmatpush3.bf16.msra.mxu1 %v2116_v2  ;;  %v2242_v59 = vmov 0.0  }
  0x4f   : > { %1889 = vmatprep.subr.bf16.mxu1 %v2119_v5 }
  0x50   : > { %1218 = vmatmul.mubr.bf16.vlgmr.msra.gmra.mrb[8].mxu0 %v1748_v62  ;;  %v320_v62 = vsub.s32 0, %v319_v61 }
  0x51   : > { %1904 = vmatpush3.bf16.msra.mxu0 %v2122_v63  ;;  %1225 = vmatprep.mubr.bf16.mxu0 %v1757_v19  ;;  %v316_v63 = vld [vmem:[%s2717_s3] sm:$0x7] }
  0x52   : > { %1905 = vmatprep.subr.bf16.mxu0 %v2125_v0  ;;  %1890 = vmatpush3.bf16.msra.mxu1 %v2120_v6  ;;  %v324_v0 = vsub.s32 1, %v319_v61  ;;  %v321_v1 = vrot.slane %v316_v63, %v320_v62 }
  0x53   : > { %1931 = vmatprep.subr.bf16.mxu1 %v2123_v9 }
  0x55   : > { %1906 = vmatpush3.bf16.msra.mxu0 %v2126_v3  ;;  %1267 = vmatmul.mubr.bf16.vlgmr.msra.gmra.mrb[4].mxu1 %v1750_v11  ;;  %v325_v3 = vrot.slane %v316_v63, %v324_v0 }
  0x56   : > { %1907 = vmatprep.subr.bf16.mxu0 %v2129_v4  ;;  %1932 = vmatpush3.bf16.msra.mxu1 %v2124_v10 }
  0x57   : > { %1933 = vmatprep.subr.bf16.mxu1 %v2127_v12  ;;  %1274 = vmatprep.mubr.bf16.mxu1 %v1759_v25 }
  0x58   : > { %1226 = vmatmul.mubr.bf16.gmra.mrb[12].mxu0 %v1756_v20 }
  0x59   : > { %1908 = vmatpush3.bf16.msra.mxu0 %v2130_v7  ;;  %1315 = vmatprep.mubr.bf16.mxu0 %v1753_v35 }
  0x5a   : > { %1909 = vmatprep.subr.bf16.mxu0 %v2133_v8  ;;  %1934 = vmatpush3.bf16.msra.mxu1 %v2128_v17 }
  0x5b   : > { %1935 = vmatprep.subr.bf16.mxu1 %v2131_v24 }
  0x5d   : > { %1910 = vmatpush3.bf16.msra.mxu0 %v2134_v13  ;;  %1275 = vmatmul.mubr.bf16.gmra.mrb[8].mxu1 %v1758_v28  ;;  %v328_v13 = vsub.s32 2, %v319_v61 }
  0x5e   : > { %1911 = vmatprep.subr.bf16.mxu0 %v2137_v14  ;;  %1936 = vmatpush3.bf16.msra.mxu1 %v2132_v26 }
  0x5f   : > { %1937 = vmatprep.subr.bf16.mxu1 %v2135_v30  ;;  %1364 = vmatprep.mubr.bf16.mxu1 %v1755_v40  ;;  %v329_v17 = vrot.slane %v316_v63, %v328_v13 }
  0x61   : > { %1912 = vmatpush3.bf16.msra.mxu0 %v2138_v18 }
  0x62   : > { %1913 = vmatprep.subr.bf16.mxu0 %v2141_v21  ;;  %1938 = vmatpush3.bf16.msra.mxu1 %v2136_v31 }
  0x63   : > { %1939 = vmatprep.subr.bf16.mxu1 %v2139_v39 }
  0x65   : > { %1914 = vmatpush3.bf16.msra.mxu0 %v2142_v27 }
  0x66   : > { %1915 = vmatprep.subr.bf16.mxu0 %v2145_v29  ;;  %1940 = vmatpush3.bf16.msra.mxu1 %v2140_v42 }
  0x67   : > { %1941 = vmatprep.subr.bf16.mxu1 %v2143_v45 }
  0x69   : > { %1916 = vmatpush3.bf16.msra.mxu0 %v2146_v34 }
  0x6a   : > { %1917 = vmatprep.subr.bf16.mxu0 %v2149_v36  ;;  %1942 = vmatpush3.bf16.msra.mxu1 %v2144_v48 }
  0x6b   : > { %1943 = vmatprep.subr.bf16.mxu1 %v2147_v49 }
  0x6d   : > { %1918 = vmatpush3.bf16.msra.mxu0 %v2150_v41  ;;  %v720_v41 = vstv %s719_s18 }
  0x6e   : > { %1944 = vmatpush3.bf16.msra.mxu1 %v2148_v50  ;;  %1987 = vmatprep.subr.bf16.mxu0 %v2242_v59 }
  0x6f   : > { %1945 = vmatprep.subr.bf16.mxu1 %v2151_v51 }
  0x70   : > { %1316 = vmatmul.mubr.bf16.vlgmr.msra.gmra.mrb[16].mxu0 %v1752_v46 }
  0x71   : > { %1323 = vmatprep.mubr.bf16.mxu0 %v1761_v47 }
  0x72   : > { %1946 = vmatpush3.bf16.msra.mxu1 %v2152_v53 }
  0x73   : > { %1993 = vmatprep.subr.bf16.mxu1 %v2242_v59 }
  0x75   : > { %1365 = vmatmul.mubr.bf16.vlgmr.msra.gmra.mrb[12].mxu1 %v1754_v56 }
  0x76   : > { %1372 = vmatprep.mubr.bf16.mxu1 %v1763_v57 }
  0x78   : > { %1324 = vmatmul.mubr.bf16.gmra.mrb[20].mxu0 %v1760_v52 }
  0x79   : > { %1989 = vmatprep.mubr.msk.bf16.mxu0 %vm2243_vm0, %v2242_v59 }
  0x7d   : > { %1373 = vmatmul.mubr.bf16.gmra.mrb[16].mxu1 %v1762_v58 }
  0x7e   : > { %1995 = vmatprep.mubr.msk.bf16.mxu1 %vm2243_vm0, %v2242_v59 }
 0x103   : > { %v507_v2 = vpop.f32.mrb[0].mxu0 }
 0x104   : > { %v509_v4 = vpop.f32.mrb[1].mxu0  ;;  %v508_v6 = vadd.f32 %v507_v2, %v321_v1 }
 0x105   : > { %v511_v5 = vpop.f32.mrb[2].mxu0  ;;  %v510_v9 = vadd.f32 %v509_v4, %v325_v3 }
 0x106   : > { %v512_v7 = vadd.f32 %v511_v5, %v321_v1  ;;  %v513_v8 = vpop.f32.mrb[3].mxu0 }
 0x107   : > { %v514_v10 = vadd.f32 %v513_v8, %v325_v3 }
 0x108   : > { %v1393_v11 = vpack.c.bf16 %v512_v7, %v508_v6  ;;  %v1985_v24 = vpop.f32.mrb[0].mxu1 }
 0x109   : > { %v1394_v12 = vpack.c.bf16 %v514_v10, %v510_v9  ;;  %v2640_v26 = vadd.f32 %v1985_v24, %v329_v17  ;;  %v560_v27 = vpop.f32.mrb[1].mxu1 }
 0x10a   : > { %v561_v28 = vadd.f32 %v560_v27, %v329_v17  ;;  %v1986_v29 = vpop.f32.mrb[2].mxu1 }
 0x10b   : > { %v517_v14 = vpop.f32.mrb[4].mxu0  ;;  %1988 = vmatpush3.bf16.xpose.msra.mxu0 %v1394_v12  ;;  %v2644_v30 = vadd.f32 %v1986_v29, %v329_v17  ;;  %v563_v31 = vpop.f32.mrb[3].mxu1 }
 0x10c   : > { %v519_v15 = vpop.f32.mrb[5].mxu0  ;;  %1999 = vmatprep.subr.bf16.mxu0 %v2242_v59  ;;  %v518_v18 = vadd.f32 %v517_v14, %v321_v1  ;;  %v564_v32 = vadd.f32 %v563_v31, %v329_v17 }
 0x10d   : > { %v521_v16 = vpop.f32.mrb[6].mxu0  ;;  %v520_v21 = vadd.f32 %v519_v15, %v325_v3  ;;  %v1577_v33 = vpack.c.bf16 %v2644_v30, %v2640_v26 }
 0x10e   : > { %v522_v19 = vadd.f32 %v521_v16, %v321_v1  ;;  %v523_v20 = vpop.f32.mrb[7].mxu0  ;;  %v1462_v34 = vpack.c.bf16 %v564_v32, %v561_v28 }
 0x10f   : > { %v524_v22 = vadd.f32 %v523_v20, %v325_v3 }
 0x110   : > { %v1509_v23 = vpack.c.bf16 %v522_v19, %v518_v18  ;;  %1994 = vmatpush3.bf16.msra.mxu1 %v1462_v34 }
 0x111   : > { %v1510_v25 = vpack.c.bf16 %v524_v22, %v520_v21  ;;  %2005 = vmatprep.subr.bf16.mxu1 %v2242_v59 }
 0x112   : > { %1990 = vmatmul.mubr.bf16.vlgmr.msra.gmra.mrb[24].mxu0 %v1393_v11 }
 0x113   : > { %2000 = vmatpush3.bf16.xpose.msra.mxu0 %v1510_v25  ;;  %2001 = vmatprep.mubr.msk.bf16.mxu0 %vm2243_vm0, %v2242_v59 }
 0x11a   : > { %2002 = vmatmul.mubr.bf16.vlgmr.msra.gmra.mrb[28].mxu0 %v1509_v23 }
 0x123   : > { %v1863_v35 = vpop.f32.mrb[8].mxu0 }
 0x124   : > { %v1864_v36 = vpop.f32.mrb[9].mxu0 }
 0x125   : > { %v1865_v37 = vadd.f32 %v1864_v36, %v1863_v35  ;;  %v1866_v38 = vpop.f32.mrb[10].mxu0 }
 0x126   : > { %v1867_v39 = vpop.f32.mrb[11].mxu0 }
 0x127   : > { %v1868_v40 = vadd.f32 %v1867_v39, %v1866_v38  ;;  %v1220_v42 = vadd.f32 %v1865_v37, %v720_v41 }
 0x128   : > { %v1891_v43 = vpop.f32.mrb[4].mxu1 }
 0x129   : > { %v1892_v44 = vpop.f32.mrb[5].mxu1  ;;  %v1223_v45 = vadd.f32 %v1868_v40, %v720_v41 }
 0x12a   : > { %v1893_v46 = vadd.f32 %v1892_v44, %v1891_v43  ;;  %v1894_v47 = vpop.f32.mrb[6].mxu1 }
 0x12b   : > { %v1869_v48 = vpop.f32.mrb[12].mxu0  ;;  %v1895_v49 = vpop.f32.mrb[7].mxu1 }
 0x12c   : > { %v1269_v50 = vadd.f32 %v1893_v46, %v1220_v42  ;;  %v1870_v51 = vpop.f32.mrb[13].mxu0  ;;  %v1896_v52 = vadd.f32 %v1895_v49, %v1894_v47 }
 0x12d   : > { %v1871_v53 = vadd.f32 %v1870_v51, %v1869_v48  ;;  %v1872_v54 = vpop.f32.mrb[14].mxu0 }
 0x12e   : > { %v1272_v55 = vadd.f32 %v1896_v52, %v1223_v45  ;;  %v1873_v56 = vpop.f32.mrb[15].mxu0 }
 0x12f   : > { %v1874_v57 = vadd.f32 %v1873_v56, %v1872_v54  ;;  %v1228_v58 = vadd.f32 %v1871_v53, %v720_v41 }
 0x130   : > { %v1897_v60 = vpop.f32.mrb[8].mxu1 }
 0x131   : > { %v1898_v61 = vpop.f32.mrb[9].mxu1  ;;  %v1231_v62 = vadd.f32 %v1874_v57, %v720_v41 }
 0x132   : > { %v1899_v63 = vadd.f32 %v1898_v61, %v1897_v60  ;;  %v1900_v0 = vpop.f32.mrb[10].mxu1 }
 0x133   : > { %v1901_v1 = vpop.f32.mrb[11].mxu1 }
 0x134   : > { %v1277_v2 = vadd.f32 %v1899_v63, %v1228_v58  ;;  %v1902_v3 = vadd.f32 %v1901_v1, %v1900_v0 }
 0x136   : > { %v1280_v4 = vadd.f32 %v1902_v3, %v1231_v62 }
 0x143   : > { %v1919_v5 = vpop.f32.mrb[16].mxu0 }
 0x144   : > { %v1920_v6 = vpop.f32.mrb[17].mxu0 }
 0x145   : > { %v1921_v7 = vadd.f32 %v1920_v6, %v1919_v5  ;;  %v1922_v8 = vpop.f32.mrb[18].mxu0 }
 0x146   : > { %v1923_v9 = vpop.f32.mrb[19].mxu0 }
 0x147   : > { %v1318_v10 = vadd.f32 %v1921_v7, %v1269_v50  ;;  %v1924_v11 = vadd.f32 %v1923_v9, %v1922_v8 }
 0x148   : > { %v1947_v20 = vpop.f32.mrb[12].mxu1 }
 0x149   : > { %v1321_v12 = vadd.f32 %v1924_v11, %v1272_v55  ;;  %v1948_v21 = vpop.f32.mrb[13].mxu1 }
 0x14a   : > { %v1949_v23 = vadd.f32 %v1948_v21, %v1947_v20  ;;  %v1950_v24 = vpop.f32.mrb[14].mxu1 }
 0x14b   : > { %v1925_v13 = vpop.f32.mrb[20].mxu0  ;;  %v1951_v25 = vpop.f32.mrb[15].mxu1 }
 0x14c   : > { %v1926_v14 = vpop.f32.mrb[21].mxu0  ;;  %v1367_v27 = vadd.f32 %v1949_v23, %v1318_v10  ;;  %v1952_v28 = vadd.f32 %v1951_v25, %v1950_v24 }
 0x14d   : > { %v1927_v15 = vadd.f32 %v1926_v14, %v1925_v13  ;;  %v1928_v16 = vpop.f32.mrb[22].mxu0 }
 0x14e   : > { %v1929_v17 = vpop.f32.mrb[23].mxu0  ;;  %v1370_v29 = vadd.f32 %v1952_v28, %v1321_v12  ;;  %v1381_v40 = vmax.f32 %v1367_v27, 1e-06 }
 0x14f   : > { %v1326_v18 = vadd.f32 %v1927_v15, %v1277_v2  ;;  %v1930_v19 = vadd.f32 %v1929_v17, %v1928_v16 }
 0x150   : > { %v1953_v31 = vpop.f32.mrb[16].mxu1  ;;  %v1382_v41 = vmax.f32 %v1370_v29, 1e-06  ;;  %2153 = vlog2.f32 %v1381_v40 }
 0x151   : > { %v1329_v22 = vadd.f32 %v1930_v19, %v1280_v4  ;;  %v1954_v32 = vpop.f32.mrb[17].mxu1 }
 0x152   : > { %v1955_v34 = vadd.f32 %v1954_v32, %v1953_v31  ;;  %v1956_v35 = vpop.f32.mrb[18].mxu1  ;;  %2155 = vlog2.f32 %v1382_v41 }
 0x153   : > { %v1957_v36 = vpop.f32.mrb[19].mxu1 }
 0x154   : > { %v1375_v37 = vadd.f32 %v1955_v34, %v1326_v18  ;;  %v1958_v38 = vadd.f32 %v1957_v36, %v1956_v35 }
 0x156   : > { %v1378_v39 = vadd.f32 %v1958_v38, %v1329_v22  ;;  %v1383_v42 = vmax.f32 %v1375_v37, 1e-06 }
 0x158   : > { %v1384_v43 = vmax.f32 %v1378_v39, 1e-06  ;;  %2157 = vlog2.f32 %v1383_v42 }
 0x15a   : > { %v2154_v44 = vpop.eup %2153  ;;  %2159 = vlog2.f32 %v1384_v43 }
 0x15b   : > { %v1386_v46 = vmul.f32 0.6931472, %v2154_v44 }
 0x15c   : > { %v2156_v45 = vpop.eup %2155 }
 0x15d   : > { %v1388_v50 = vmul.f32 0.6931472, %v2156_v45 }
 0x162   : > { %v2158_v55 = vpop.eup %2157 }
 0x163   : > { %v1390_v58 = vmul.f32 0.6931472, %v2158_v55 }
 0x164   : > { %v2160_v56 = vpop.eup %2159 }
 0x165   : > { %v1392_v63 = vmul.f32 0.6931472, %v2160_v56 }
 0x1e5   : > { %v1429_v47 = vpop.f32.mrb[24].mxu0 }
 0x1e6   : > { %v1436_v48 = vadd.f32 %v1429_v47, %v1386_v46  ;;  %v1991_v49 = vpop.f32.mrb[25].mxu0 }
 0x1e7   : > { %v1432_v51 = vpop.f32.mrb[26].mxu0 }
 0x1e8   : > { %v1437_v52 = vadd.f32 %v1432_v51, %v1388_v50  ;;  %v1992_v53 = vpop.f32.mrb[27].mxu0  ;;  %v1439_v54 = vsel %vm1438_vm1, %v1436_v48, -inf }
 0x1e9   : > { %1440 = vmax.xlane.f32.xlu0 %v1439_v54 }
 0x1ea   : > { %v1442_v57 = vsel %vm1438_vm1, %v1437_v52, -inf }
 0x1ed   : > { %1443 = vmax.xlane.f32.xlu0 %v1442_v57  ;;  %v1545_v60 = vpop.f32.mrb[28].mxu0 }
 0x1ee   : > { %v1552_v61 = vadd.f32 %v1545_v60, %v1390_v58  ;;  %v2003_v62 = vpop.f32.mrb[29].mxu0 }
 0x1ef   : > { %v1548_v0 = vpop.f32.mrb[30].mxu0 }
 0x1f0   : > { %v1553_v1 = vadd.f32 %v1548_v0, %v1392_v63  ;;  %v2004_v2 = vpop.f32.mrb[31].mxu0  ;;  %v1554_v3 = vsel %vm1438_vm1, %v1552_v61, -inf }
 0x1f1   : > { %1555 = vmax.xlane.f32.xlu1 %v1554_v3 }
 0x1f2   : > { %v1557_v4 = vsel %vm1438_vm1, %v1553_v1, -inf }
 0x1f5   : > { %1558 = vmax.xlane.f32.xlu1 %v1557_v4 }
 0x276   : > { %v1441_v5 = vpop.xlane.xlu0 %1440 }
 0x277   : > { %v1445_v6 = vsub.f32 %v1436_v48, %v1441_v5 }
 0x279   : > { %v1447_v7 = vmul.f32 1.442695, %v1445_v6 }
 0x27a   : > { %v1444_v8 = vpop.xlane.xlu0 %1443 }
 0x27b   : > { %2161 = vpow2.f32 %v1447_v7  ;;  %v1446_v9 = vsub.f32 %v1437_v52, %v1444_v8 }
 0x27d   : > { %v1449_v10 = vmul.f32 1.442695, %v1446_v9 }
 0x27e   : > { %v1556_v11 = vpop.xlane.xlu1 %1555 }
 0x27f   : > { %2163 = vpow2.f32 %v1449_v10  ;;  %v1560_v12 = vsub.f32 %v1552_v61, %v1556_v11 }
 0x281   : > { %v1562_v13 = vmul.f32 1.442695, %v1560_v12 }
 0x282   : > { %v1559_v14 = vpop.xlane.xlu1 %1558 }
 0x283   : > { %2165 = vpow2.f32 %v1562_v13  ;;  %v1561_v15 = vsub.f32 %v1553_v1, %v1559_v14 }
 0x285   : > { %v2162_v16 = vpop.eup %2161  ;;  %v1564_v17 = vmul.f32 1.442695, %v1561_v15 }
 0x286   : > { %v1451_v18 = vsel %vm1438_vm1, %v2162_v16, 0.0 }
 0x287   : > { %2167 = vpow2.f32 %v1564_v17  ;;  %1452 = vadd.xlane.f32.xlu0 %v1451_v18 }
 0x289   : > { %v2164_v19 = vpop.eup %2163 }
 0x28a   : > { %v1454_v20 = vsel %vm1438_vm1, %v2164_v19, 0.0 }
 0x28b   : > { %1455 = vadd.xlane.f32.xlu1 %v1454_v20 }
 0x28d   : > { %v2166_v21 = vpop.eup %2165 }
 0x28e   : > { %v1566_v22 = vsel %vm1438_vm1, %v2166_v21, 0.0 }
 0x28f   : > { %1567 = vadd.xlane.f32.xlu0 %v1566_v22 }
 0x291   : > { %v2168_v23 = vpop.eup %2167 }
 0x292   : > { %v1569_v24 = vsel %vm1438_vm1, %v2168_v23, 0.0 }
 0x293   : > { %1570 = vadd.xlane.f32.xlu1 %v1569_v24 }
 0x314   : > { %v1453_v25 = vpop.xlane.xlu0 %1452 }
 0x315   : > { %2169 = vrcp.f32 %v1453_v25 }
 0x318   : > { %v1456_v27 = vpop.xlane.xlu1 %1455 }
 0x319   : > { %2171 = vrcp.f32 %v1456_v27 }
 0x31c   : > { %v1568_v28 = vpop.xlane.xlu0 %1567 }
 0x31d   : > { %2173 = vrcp.f32 %v1568_v28 }
 0x31f   : > { %v2170_v31 = vpop.eup %2169 }
 0x320   : > { %v1571_v29 = vpop.xlane.xlu1 %1570  ;;  %v1459_v34 = vmul.f32 %v2170_v31, %v2162_v16 }
 0x321   : > { %2175 = vrcp.f32 %v1571_v29 }
 0x323   : > { %v2172_v32 = vpop.eup %2171 }
 0x324   : > { %v1460_v35 = vmul.f32 %v2172_v32, %v2164_v19 }
 0x326   : > { %v1461_v36 = vpack.c.bf16 %v1460_v35, %v1459_v34 }
 0x327   : > { %v2174_v37 = vpop.eup %2173 }
 0x328   : > { %1996 = vmatmul.mubr.msk.bf16.vlgmr.msra.gmra.mrb[20].mxu1 %vm1438_vm1, %v1461_v36  ;;  %v1574_v39 = vmul.f32 %v2174_v37, %v2166_v21 }
 0x329   : > { %2006 = vmatpush3.bf16.msra.mxu1 %v1577_v33  ;;  %2007 = vmatprep.mubr.msk.bf16.mxu1 %vm2243_vm0, %v2242_v59 }
 0x32b   : > { %v2176_v38 = vpop.eup %2175 }
 0x32c   : > { %v1575_v40 = vmul.f32 %v2176_v38, %v2168_v23 }
 0x32e   : > { %v1576_v41 = vpack.c.bf16 %v1575_v40, %v1574_v39 }
 0x330   : > { %2008 = vmatmul.mubr.msk.bf16.vlgmr.msra.gmra.mrb[24].mxu1 %vm1438_vm1, %v1576_v41 }
 0x3fb   : > { %v1500_v42 = vpop.f32.mrb[20].mxu1 }
 0x3fc   : > { %1507 = vst [vmem:[%s264_s21] sm:$0xff] %v1500_v42  ;;  %v1997_v43 = vpop.f32.mrb[21].mxu1 }
 0x3fd   : > { %v1503_v44 = vpop.f32.mrb[22].mxu1 }
 0x3fe   : > { %1508 = vst [vmem:[%s264_s21 + $0x8] sm:$0xff] %v1503_v44  ;;  %v1998_v26 = vpop.f32.mrb[23].mxu1 }
 0x403   : > { %v1615_v59 = vpop.f32.mrb[24].mxu1 }
 0x404   : > { %1622 = vst [vmem:[%s264_s21 + $0x10] sm:$0xff] %v1615_v59  ;;  %v2009_v30 = vpop.f32.mrb[25].mxu1 }
 0x405   : > { %v1618_v33 = vpop.f32.mrb[26].mxu1 }
 0x406   : > { %1623 = vst [vmem:[%s264_s21 + $0x18] sm:$0xff] %v1618_v33  ;;  %v2010_v45 = vpop.f32.mrb[27].mxu1 }
 0x407   : > { %2190 = shalt.err (!%p2187_p3)
}
 0x408   : > { %s2191_s16 = scalar_lea.hbm %s2671_s30, 512  ;;  %s2195_s18 = scalar_lea.hbm %s2720_s6, 1024 }
 0x409   : > { %p2192_p4 = scmp.ne.s32.totalorder %s2671_s30, %s2191_s16  ;;  %p2196_p9 = scmp.lt.u32.totalorder %s2671_s30, %s2720_s6 }
 0x40a   : > { %p2197_p10 = scmp.lt.u32.totalorder %s2195_s18, %s2191_s16  ;;  %p2199_p12 = scmp.lt.u32.totalorder %s2191_s16, %s2671_s30 }
 0x40b   : > { %p2193_p7 = pnand %p2192_p4, %p2323_p5 }
 0x40c   : > { %p2198_p11 = por %p2197_p10, %p2196_p9 }
 0x40d   : > { %p2194_p8 = pneg %p2193_p7 }
 0x40e   : > { %p2200_p13 = por %p2199_p12, %p2198_p11 }
 0x410   : > { %p2201_p0 = pnand %p2200_p13, %p2194_p8 }
 0x412   : > { %2204 = shalt.err (!%p2201_p0)
}
 0x413   : > { %s2245_s21 = smov 128   ;;  %s2246_s13 = smov 8  }
 0x414   : > { %2011 = dma.vmem_to_hbm [thread:$0]  (%p2323_p5), %s2666_s22, 512, %s2671_s30, %s2673_s10, %s2245_s21, %s2245_s21, %s2246_s13  }
 0x415 PF: > { %p2017_p1 = scmp.ge.s32.totalorder %s2239_s26, 2  ;;  %s1653_s27 = sand.u32 1, %s2227_s23  }
 0x416   : > { %s1654_s29 = scalar_lea.sflag [#allocation4], %s1653_s27 }
 0x417   : > { %p2014_p2 = pnand %p2017_p1, %p2327_p6 }
 0x419   : > { %2222 = dma.done.wait (!%p2014_p2), %s1654_s29, 512  }
 0x41a   : > { %2224 = vsyncadd (!%p2014_p2), %s1654_s29, 4294966784  ;;  %p17_p3 = scmp.ge.s32.totalorder %s2310_s28, 4   ;;  %s2723_s23 = smov %s2231_s24 }
 0x41b   : > { %s2724_s24 = smov %s2235_s25  ;;  %s2725_s25 = smov %s2321_s7 }
 0x41c   : > { %s2726_s26 = smov %s2310_s28  ;;  %19 = sbr.rel (!%p17_p3) target bundleno = 5 (0x5), region = 82 }
 0x423   :  { %1659 = vsyncpa [#allocation4], 1 }
 0x424   :  { %1661 = vsyncpa [#allocation4 + $0x1], 1 }

</bundles_post_ra>
